<compile_context>
chip_gen: v6e
topology: v6e:2x2x1
jax: 0.10.0
libtpu: 0.0.40
codegen_flags: <defaults>
</compile_context>

<pallas_src>
import functools

import jax
import jax.numpy as jnp
from jax.experimental import pallas as pl
from jax.experimental.pallas import tpu as pltpu

ALPHA = 0.25
GAMMA = 2.0  # module default; explicit square used for this value


def _round_up(x, m):
    return ((x + m - 1) // m) * m


def _cdiv(a, b):
    return -(-a // b)


def _focal_loss_kernel(x_ref, t_ref, out_ref, acc_ref, *,
                       true_l, tile_l, alpha, gamma):
    # x_ref: (Bb, C, TL) logits     t_ref: (Bb, TL) int32 targets
    # out_ref: (Bb, 1) per-row loss sums   acc_ref: (Bb, TL) f32 lane accumulator
    lt = pl.program_id(1)

    @pl.when(lt == 0)
    def _():
        acc_ref[...] = jnp.zeros_like(acc_ref)

    x = x_ref[...].astype(jnp.float32)            # (Bb, C, TL)
    t = t_ref[...]                                # (Bb, TL)

    # log_softmax over the class axis, evaluated only at the target class:
    #   log_pt_t = (x_t - max) - log(sum_c exp(x_c - max))
    m = jnp.max(x, axis=1, keepdims=True)                       # (Bb, 1, TL)
    sh = x - m                                                  # (Bb, C, TL)
    lse = jnp.log(jnp.sum(jnp.exp(sh), axis=1))                 # (Bb, TL)

    cls_idx = jax.lax.broadcasted_iota(jnp.int32, x.shape, 1)   # (Bb, C, TL)
    sh_t = jnp.sum(jnp.where(cls_idx == t[:, None, :], sh, 0.0), axis=1)  # (Bb, TL)

    log_pt_t = sh_t - lse                                       # (Bb, TL)
    pt_t = jnp.exp(log_pt_t)
    w = 1.0 - pt_t
    if gamma == 2.0:
        mod = w * w
    elif gamma == 1.0:
        mod = w
    else:
        mod = jnp.power(w, jnp.float32(gamma))
    per_pos = (-alpha) * mod * log_pt_t                         # (Bb, TL)

    # Mask lanes beyond the true sequence length (ragged last L tile). This is a
    # select, so NaN/garbage from the unread tail cannot reach the accumulator.
    if true_l % tile_l != 0:
        lane = jax.lax.broadcasted_iota(jnp.int32, per_pos.shape, 1)
        per_pos = jnp.where(lt * tile_l + lane < true_l, per_pos, 0.0)

    acc_ref[...] += per_pos

    @pl.when(lt == pl.num_programs(1) - 1)
    def _():
        out_ref[...] = jnp.sum(acc_ref[...], axis=1, keepdims=True)


def focal_loss_1d(inputs, targets, alpha=ALPHA, gamma=GAMMA):
    """inputs: (B, C, L) float (f32/bf16) logits; targets: (B, L) int class indices.
    Returns scalar f32 focal loss (alpha=0.25, gamma=2, reduction='mean')."""
    B, C, L = inputs.shape
    targets = targets.astype(jnp.int32)
    itemsize = jnp.dtype(inputs.dtype).itemsize

    # --- Tiling: size the logits block to ~2 MiB, then fill with batch rows. ---
    TARGET_BLOCK_BYTES = 2 << 20
    TL = min(_round_up(L, 128),
             _round_up(max(128, TARGET_BLOCK_BYTES // (C * itemsize)), 128))
    NT = _cdiv(L, TL)
    row_bytes = C * TL * itemsize
    Bb = int(max(1, min(B, TARGET_BLOCK_BYTES // row_bytes)))
    NB = _cdiv(B, Bb)

    # Double-buffered inputs + scratch + output, with compiler headroom; keep the
    # request well under the v7x 64 MiB per-TC VMEM.
    block_bytes = (2 * Bb * C * TL * itemsize   # logits (double-buffered)
                   + 2 * Bb * TL * 4            # targets (double-buffered)
                   + Bb * TL * 4                # lane accumulator scratch
                   + 2 * Bb * 4)                # output
    vmem_limit = int(min(48 << 20, max(8 << 20, block_bytes + (4 << 20))))

    cost = pl.CostEstimate(
        flops=int(8 * B * C * L),
        transcendentals=int(B * L * (C + 2)),
        bytes_accessed=int(inputs.nbytes + targets.nbytes + B * 4),
    )

    kernel = functools.partial(_focal_loss_kernel, true_l=L, tile_l=TL,
                               alpha=float(alpha), gamma=float(gamma))

    per_row = pl.pallas_call(
        kernel,
        out_shape=jax.ShapeDtypeStruct((B, 1), jnp.float32),
        grid=(NB, NT),
        in_specs=[
            pl.BlockSpec((Bb, C, TL), lambda b, lt: (b, 0, lt)),
            pl.BlockSpec((Bb, TL), lambda b, lt: (b, lt)),
        ],
        out_specs=pl.BlockSpec((Bb, 1), lambda b, lt: (b, 0)),
        scratch_shapes=[pltpu.VMEM((Bb, TL), jnp.float32)],
        compiler_params=pltpu.CompilerParams(
            dimension_semantics=("parallel", "arbitrary"),
            vmem_limit_bytes=vmem_limit,
        ),
        cost_estimate=cost,
    )(inputs, targets)

    # reduction='mean' over the (B, L) per-position loss.
    return jnp.sum(per_row) / jnp.float32(B * L)


def _focal_loss_ref(inputs, targets, alpha=ALPHA, gamma=GAMMA):
    # pure-JAX reference mirroring the PyTorch forward
    log_pt = jax.nn.log_softmax(inputs.astype(jnp.float32), axis=1)
    pt = jnp.exp(log_pt)
    C = inputs.shape[1]
    one_hot = jnp.transpose(jax.nn.one_hot(targets, C, dtype=jnp.float32), (0, 2, 1))
    alpha_t = alpha * one_hot + (1 - alpha) * (1 - one_hot)
    loss = -alpha_t * (1 - pt) ** gamma * log_pt
    loss = jnp.sum(one_hot * loss, axis=1)
    return jnp.mean(loss)


if __name__ == "__main__":
    key = jax.random.PRNGKey(0)
    k1, k2 = jax.random.split(key)

    B, C, L = 2, 4, 16
    inputs = jax.random.normal(k1, (B, C, L), dtype=jnp.float32)
    targets = jax.random.randint(k2, (B, L), 0, C, dtype=jnp.int32)

    out = focal_loss_1d(inputs, targets)
    out = jax.block_until_ready(out)

    ref = _focal_loss_ref(inputs, targets)
    assert jnp.allclose(out, ref, atol=1e-5, rtol=1e-5), (out, ref)

    print("KERNEL_OK")
</pallas_src>

<mosaic_0001>
module attributes {stable_mosaic.version = 11 : i64} {
  func.func @_focal_loss_kernel(%arg0: i32, %arg1: i32, %arg2: memref<2x4x128xf32, #tpu.memory_space<vmem>>, %arg3: memref<2x128xi32, #tpu.memory_space<vmem>>, %arg4: memref<2x1xf32, #tpu.memory_space<vmem>>, %arg5: memref<2x128xf32, #tpu.memory_space<vmem>>) attributes {dimension_semantics = [#tpu.dimension_semantics<parallel>, #tpu.dimension_semantics<arbitrary>], iteration_bounds = array<i64: 1, 1>, scalar_prefetch = 0 : i64, scratch_operands = 1 : i64, tpu.core_type = #tpu.core_type<tc>, window_params = [{transform_indices = @transform_0, window_bounds = array<i64: 2, 4, 128>}, {transform_indices = @transform_1, window_bounds = array<i64: 2, 128>}, {transform_indices = @transform_2, window_bounds = array<i64: 2, 1>}]} {
    %c0_i32 = arith.constant 0 : i32
    %0 = arith.cmpi eq, %arg1, %c0_i32 : i32
    %1 = arith.extui %0 : i1 to i32
    %c0_i32_0 = arith.constant 0 : i32
    %2 = arith.cmpi ne, %1, %c0_i32_0 : i32
    scf.if %2 {
      %cst_17 = arith.constant 0.000000e+00 : f32
      %41 = vector.broadcast %cst_17 : f32 to vector<2x128xf32>
      %c0_18 = arith.constant 0 : index
      %c0_19 = arith.constant 0 : index
      %42 = vector.load %arg5[%c0_18, %c0_19] : memref<2x128xf32, #tpu.memory_space<vmem>>, vector<2x128xf32>
      tpu.vector_store %arg5[%c0_18, %c0_19], %41 {strides = array<i32>} : memref<2x128xf32, #tpu.memory_space<vmem>>, vector<2x128xf32>,
    } else {
    }
    %c0 = arith.constant 0 : index
    %c0_1 = arith.constant 0 : index
    %c0_2 = arith.constant 0 : index
    %3 = vector.load %arg2[%c0, %c0_1, %c0_2] : memref<2x4x128xf32, #tpu.memory_space<vmem>>, vector<2x4x128xf32>
    %c0_3 = arith.constant 0 : index
    %c0_4 = arith.constant 0 : index
    %4 = vector.load %arg3[%c0_3, %c0_4] : memref<2x128xi32, #tpu.memory_space<vmem>>, vector<2x128xi32>
    %cst = arith.constant dense<0xFF800000> : vector<2x128xf32>
    %5 = vector.multi_reduction <maximumf>, %3, %cst [1] : vector<2x4x128xf32> to vector<2x128xf32>
    %6 = vector.shape_cast %5 : vector<2x128xf32> to vector<2x1x128xf32>
    %7 = vector.broadcast %6 : vector<2x1x128xf32> to vector<2x4x128xf32>
    %8 = arith.subf %3, %7 : vector<2x4x128xf32>
    %9 = math.exp %8 : vector<2x4x128xf32>
    %cst_5 = arith.constant dense<0.000000e+00> : vector<2x128xf32>
    %10 = vector.multi_reduction <add>, %9, %cst_5 [1] : vector<2x4x128xf32> to vector<2x128xf32>
    %11 = math.log %10 : vector<2x128xf32>
    %12 = tpu.iota {dimensions = array<i32: 1>} : vector<2x4x128xi32>
    %13 = vector.shape_cast %4 : vector<2x128xi32> to vector<2x1x128xi32>
    %14 = vector.broadcast %13 : vector<2x1x128xi32> to vector<2x4x128xi32>
    %15 = arith.cmpi eq, %12, %14 : vector<2x4x128xi32>
    %cst_6 = arith.constant 0.000000e+00 : f32
    %16 = vector.broadcast %cst_6 : f32 to vector<2x4x128xf32>
    %17 = arith.select %15, %8, %16 : vector<2x4x128xi1>, vector<2x4x128xf32>
    %cst_7 = arith.constant dense<0.000000e+00> : vector<2x128xf32>
    %18 = vector.multi_reduction <add>, %17, %cst_7 [1] : vector<2x4x128xf32> to vector<2x128xf32>
    %19 = arith.subf %18, %11 : vector<2x128xf32>
    %20 = math.exp %19 : vector<2x128xf32>
    %cst_8 = arith.constant 1.000000e+00 : f32
    %21 = vector.broadcast %cst_8 : f32 to vector<2x128xf32>
    %22 = arith.subf %21, %20 : vector<2x128xf32>
    %23 = arith.mulf %22, %22 : vector<2x128xf32>
    %cst_9 = arith.constant -2.500000e-01 : f32
    %24 = vector.broadcast %cst_9 : f32 to vector<2x128xf32>
    %25 = arith.mulf %24, %23 : vector<2x128xf32>
    %26 = arith.mulf %25, %19 : vector<2x128xf32>
    %27 = tpu.iota {dimensions = array<i32: 1>} : vector<2x128xi32>
    %c128_i32 = arith.constant 128 : i32
    %28 = arith.muli %arg1, %c128_i32 : i32
    %29 = vector.broadcast %28 : i32 to vector<2x128xi32>
    %30 = arith.addi %29, %27 : vector<2x128xi32>
    %c16_i32 = arith.constant 16 : i32
    %31 = vector.broadcast %c16_i32 : i32 to vector<2x128xi32>
    %32 = arith.cmpi slt, %30, %31 : vector<2x128xi32>
    %cst_10 = arith.constant 0.000000e+00 : f32
    %33 = vector.broadcast %cst_10 : f32 to vector<2x128xf32>
    %34 = arith.select %32, %26, %33 : vector<2x128xi1>, vector<2x128xf32>
    %c0_11 = arith.constant 0 : index
    %c0_12 = arith.constant 0 : index
    %35 = vector.load %arg5[%c0_11, %c0_12] : memref<2x128xf32, #tpu.memory_space<vmem>>, vector<2x128xf32>
    %36 = arith.addf %35, %34 : vector<2x128xf32>
    %c0_13 = arith.constant 0 : index
    %c0_14 = arith.constant 0 : index
    %37 = vector.load %arg5[%c0_13, %c0_14] : memref<2x128xf32, #tpu.memory_space<vmem>>, vector<2x128xf32>
    tpu.vector_store %arg5[%c0_13, %c0_14], %36 {strides = array<i32>} : memref<2x128xf32, #tpu.memory_space<vmem>>, vector<2x128xf32>,
    %c0_i32_15 = arith.constant 0 : i32
    %38 = arith.cmpi eq, %arg1, %c0_i32_15 : i32
    %39 = arith.extui %38 : i1 to i32
    %c0_i32_16 = arith.constant 0 : i32
    %40 = arith.cmpi ne, %39, %c0_i32_16 : i32
    scf.if %40 {
      %c0_17 = arith.constant 0 : index
      %c0_18 = arith.constant 0 : index
      %41 = vector.load %arg5[%c0_17, %c0_18] : memref<2x128xf32, #tpu.memory_space<vmem>>, vector<2x128xf32>
      %cst_19 = arith.constant dense<0.000000e+00> : vector<2xf32>
      %42 = vector.multi_reduction <add>, %41, %cst_19 [1] : vector<2x128xf32> to vector<2xf32>
      %43 = vector.shape_cast %42 : vector<2xf32> to vector<2x1xf32>
      %c0_20 = arith.constant 0 : index
      %c0_21 = arith.constant 0 : index
      %44 = vector.load %arg4[%c0_20, %c0_21] : memref<2x1xf32, #tpu.memory_space<vmem>>, vector<2x1xf32>
      tpu.vector_store %arg4[%c0_20, %c0_21], %43 {strides = array<i32>} : memref<2x1xf32, #tpu.memory_space<vmem>>, vector<2x1xf32>,
    } else {
    }
    return
  }
  func.func @transform_0(%arg0: i32, %arg1: i32) -> (i32, i32, i32) {
    %c0_i32 = arith.constant 0 : i32
    %c0_i32_0 = arith.constant 0 : i32
    return %arg0, %c0_i32, %arg1 : i32, i32, i32
  }
  func.func @transform_1(%arg0: i32, %arg1: i32) -> (i32, i32) {
    %c0_i32 = arith.constant 0 : i32
    return %arg0, %arg1 : i32, i32
  }
  func.func @transform_2(%arg0: i32, %arg1: i32) -> (i32, i32) {
    %c0_i32 = arith.constant 0 : i32
    %c0_i32_0 = arith.constant 0 : i32
    return %arg0, %c0_i32 : i32, i32
  }
}

</mosaic_0001>

<bundles_post_ra>
// kernel: tpu_custom_call.1
= control target key start
LH: loop header
LB: loop body
LE: loop exit
PB: predicated region body
PF: predicated region fallthrough
CT: control target
= control target key end

     0   :  { %7 = vsyncpa [#allocation4], 0  ;;  %s280_s0 = inlined_call_operand.hbm [shape: f32[2,4,16], index: 0, kind: input, shape index: {}]   ;;  %s281_s1 = inlined_call_operand.hbm [shape: s32[2,16], index: 1, kind: input, shape index: {}]   ;;  %s282_s2 = inlined_call_operand.vmem [shape: f32[2,1], index: 2, kind: output, shape index: {}]  }
   0x1   :  { %8 = vsyncpa [#allocation6], 0  ;;  %s242_s9 = smov [#allocation3]  }
   0x2   :  { %s14_s10 = sshll.u32 %s242_s9, 4  ;;  %s15_s10 = int_to_ptr.vmem [resolvable:$true] %s14_s10 }
   0x3   :  { %s206_s11 = scalar_lea.vmem %s15_s10, 128  ;;  %p211_p1 = scmp.lt.s32.totalorder %s15_s10, %s15_s10 }
   0x4   :  { %p207_p0 = scmp.ne.s32.totalorder %s15_s10, %s206_s11  ;;  %p212_p2 = scmp.lt.s32.totalorder %s206_s11, %s206_s11 }
   0x6   :  { %p213_p3 = por %p212_p2, %p211_p1 }
   0x8   :  { %p214_p4 = pnand %p213_p3, %p207_p0 }
   0xa   :  { %217 = shalt.err (!%p214_p4)
}
   0xb   :  { %s243_s12 = smov 64   ;;  %s244_s13 = smov 4  }
   0xc   :  { %20 = dma.hbm_to_vmem [thread:$0]  %s280_s0, 128, %s15_s10, [#allocation4], %s243_s12, %s243_s12, %s244_s13  }
   0xd   :  { %s245_s16 = smov [#allocation5]  }
   0xe   :  { %s27_s17 = sshll.u32 %s245_s16, 4  ;;  %s28_s17 = int_to_ptr.vmem [resolvable:$true] %s27_s17 }
   0xf   :  { %s226_s18 = scalar_lea.vmem %s28_s17, 32  ;;  %p231_p6 = scmp.lt.s32.totalorder %s28_s17, %s28_s17 }
  0x10   :  { %p227_p5 = scmp.ne.s32.totalorder %s28_s17, %s226_s18  ;;  %p232_p7 = scmp.lt.s32.totalorder %s226_s18, %s226_s18 }
  0x12   :  { %p233_p8 = por %p232_p7, %p231_p6 }
  0x14   :  { %p234_p9 = pnand %p233_p8, %p227_p5 }
  0x16   :  { %237 = shalt.err (!%p234_p9)
}
  0x17   :  { %30 = dma.hbm_to_vmem [thread:$0]  %s281_s1, 32, %s28_s17, [#allocation6]  }
  0x18   :  { %238 = dma.done.wait [#allocation4], 128  }
  0x19   :  { %239 = vsyncadd [#allocation4], 4294967168 }
  0x1a   :  { %240 = dma.done.wait [#allocation6], 32  }
  0x1b   :  { %241 = vsyncadd [#allocation6], 4294967264  ;;  %v246_v0 = vmov 0.0   ;;  %vm45_vm0 = vcmask 1043456   ;;  %v42_v1 = vld [vmem:[#allocation3] sm:$0xf]  ;;  %v84_v13 = vlaneseq }
  0x1c   :  { %41 = vst [vmem:[#allocation2] sm:$0x3] %v246_v0  ;;  %v43_v2 = vld [vmem:[#allocation3 + $0x4] sm:$0xf]  ;;  %v46_v3 = vsel %vm45_vm0, %v42_v1, -inf  ;;  %vm156_vm3 = vcmask 1041409  }
  0x1d   :  { %v53_v4 = vsel %vm45_vm0, %v43_v2, -inf  ;;  %v47_v5 = vrot.slane %v46_v3, 4  ;;  %v247_v14 = vmov 1966171168   ;;  %v85_v20 = vshrl.u32 %v84_v13, 7 }
  0x1e   :  { %v54_v6 = vrot.slane %v53_v4, 4  ;;  %v95_v15 = vunpack.c.l.s4 %v247_v14  ;;  %v179_v22 = vld.sshfl [vmem:[#allocation5] sm:$0x11 pattern:$0x75316420]  ;;  %vm167_vm5 = vcmask 1041408  }
  0x1f   :  { %v48_v7 = vmax.f32 %v46_v3, %v47_v5  ;;  %v93_v28 = vcombine.high %v179_v22, %v179_v22  ;;  %v110_v30 = vsub.s32 0, %v85_v20  ;;  %vm171_vm6 = vcmask 1024  }
  0x20   :  { %v55_v8 = vmax.f32 %v53_v4, %v54_v6  ;;  %v96_v21 = vunpack.c.0.s8 %v95_v15 }
  0x21   :  { %v49_v9 = vrot.slane %v48_v7, 2 }
  0x22   :  { %v56_v10 = vrot.slane %v55_v8, 2  ;;  %v99_v27 = vsub.s32 %v96_v21, %v85_v20 }
  0x23   :  { %v50_v11 = vmax.f32 %v48_v7, %v49_v9 }
  0x24   :  { %v57_v12 = vmax.f32 %v55_v8, %v56_v10  ;;  %v100_v29 = vrot.slane %v179_v22, %v99_v27  ;;  %v107_v31 = vrot.slane %v93_v28, %v99_v27  ;;  %v160_v22 = vld [vmem:[#allocation2] sm:$0x3] }
  0x25   :  { %v51_v16 = vrot.slane %v50_v11, 1 }
  0x26   :  { %v58_v17 = vrot.slane %v57_v12, 1  ;;  %v111_v32 = vrot.slane %v100_v29, %v110_v30  ;;  %v115_v33 = vrot.slane %v107_v31, %v110_v30 }
  0x27   :  { %v52_v18 = vmax.f32 %v50_v11, %v51_v16 }
  0x28   :  { %v59_v19 = vmax.f32 %v57_v12, %v58_v17  ;;  %vm116_vm1 = vcmp.eq.s32.totalorder %v85_v20, %v111_v32  ;;  %vm117_vm2 = vcmp.eq.s32.totalorder %v85_v20, %v115_v33  ;;  %v149_v17 = vand.u32 127, %v84_v13 }
  0x29   :  { %v60_v23 = vsub.f32 %v42_v1, %v52_v18 }
  0x2a   :  { %v61_v24 = vsub.f32 %v43_v2, %v59_v19  ;;  %vm153_vm4 = vcmp.lt.s32.totalorder %v149_v17, 16 }
  0x2b   :  { %v62_v25 = vmul.f32 1.442695, %v60_v23  ;;  %v118_v35 = vsel %vm116_vm1, %v60_v23, 0.0 }
  0x2c   :  { %v64_v26 = vmul.f32 1.442695, %v61_v24  ;;  %v119_v38 = vsel %vm117_vm2, %v61_v24, 0.0  ;;  %v120_v42 = vsel %vm45_vm0, %v118_v35, 0.0 }
  0x2d   :  { %186 = vpow2.f32 %v62_v25  ;;  %v127_v44 = vsel %vm45_vm0, %v119_v38, 0.0  ;;  %v121_v47 = vrot.slane %v120_v42, 4 }
  0x2e   :  { %188 = vpow2.f32 %v64_v26  ;;  %v128_v49 = vrot.slane %v127_v44, 4 }
  0x2f   :  { %v122_v53 = vadd.f32 %v121_v47, %v120_v42 }
  0x30   :  { %v129_v55 = vadd.f32 %v128_v49, %v127_v44 }
  0x31   :  { %v123_v58 = vrot.slane %v122_v53, 2 }
  0x32   :  { %v130_v59 = vrot.slane %v129_v55, 2 }
  0x33   :  { %v124_v60 = vadd.f32 %v123_v58, %v122_v53 }
  0x34   :  { %v131_v61 = vadd.f32 %v130_v59, %v129_v55 }
  0x35   :  { %v125_v62 = vrot.slane %v124_v60, 1 }
  0x36   :  { %v132_v63 = vrot.slane %v131_v61, 1 }
  0x37   :  { %v126_v0 = vadd.f32 %v125_v62, %v124_v60 }
  0x38   :  { %v133_v2 = vadd.f32 %v132_v63, %v131_v61 }
  0x3a   :  { %v187_v34 = vpop.eup %186 }
  0x3b   :  { %v189_v36 = vpop.eup %188  ;;  %v66_v37 = vsel %vm45_vm0, %v187_v34, 0.0 }
  0x3c   :  { %v67_v39 = vrot.slane %v66_v37, 4  ;;  %v73_v40 = vsel %vm45_vm0, %v189_v36, 0.0 }
  0x3d   :  { %v74_v41 = vrot.slane %v73_v40, 4 }
  0x3e   :  { %v68_v43 = vadd.f32 %v67_v39, %v66_v37 }
  0x3f   :  { %v75_v45 = vadd.f32 %v74_v41, %v73_v40 }
  0x40   :  { %v69_v46 = vrot.slane %v68_v43, 2 }
  0x41   :  { %v76_v48 = vrot.slane %v75_v45, 2 }
  0x42   :  { %v70_v50 = vadd.f32 %v69_v46, %v68_v43 }
  0x43   :  { %v77_v51 = vadd.f32 %v76_v48, %v75_v45 }
  0x44   :  { %v71_v52 = vrot.slane %v70_v50, 1 }
  0x45   :  { %v78_v54 = vrot.slane %v77_v51, 1 }
  0x46   :  { %v72_v56 = vadd.f32 %v71_v52, %v70_v50 }
  0x47   :  { %v79_v57 = vadd.f32 %v78_v54, %v77_v51 }
  0x48   :  { %190 = vlog2.f32 %v72_v56 }
  0x49   :  { %192 = vlog2.f32 %v79_v57 }
  0x55   :  { %v191_v1 = vpop.eup %190 }
  0x56   :  { %v193_v3 = vpop.eup %192  ;;  %v81_v4 = vmul.f32 0.6931472, %v191_v1 }
  0x57   :  { %v83_v5 = vmul.f32 0.6931472, %v193_v3 }
  0x58   :  { %v134_v6 = vsub.f32 %v126_v0, %v81_v4 }
  0x59   :  { %v135_v7 = vsub.f32 %v133_v2, %v83_v5 }
  0x5a   :  { %v136_v8 = vmul.f32 1.442695, %v134_v6 }
  0x5b   :  { %v138_v9 = vmul.f32 1.442695, %v135_v7 }
  0x5c   :  { %194 = vpow2.f32 %v136_v8 }
  0x5d   :  { %196 = vpow2.f32 %v138_v9 }
  0x69   :  { %v195_v10 = vpop.eup %194 }
  0x6a   :  { %v197_v11 = vpop.eup %196  ;;  %v140_v12 = vsub.f32 1.0, %v195_v10 }
  0x6b   :  { %v141_v14 = vsub.f32 1.0, %v197_v11 }
  0x6c   :  { %v142_v15 = vmul.f32 %v140_v12, %v140_v12 }
  0x6d   :  { %v143_v16 = vmul.f32 %v141_v14, %v141_v14 }
  0x6e   :  { %v144_v18 = vmul.f32 -0.25, %v142_v15 }
  0x6f   :  { %v145_v19 = vmul.f32 -0.25, %v143_v16 }
  0x70   :  { %v146_v20 = vmul.f32 %v144_v18, %v134_v6 }
  0x71   :  { %v147_v21 = vmul.f32 %v145_v19, %v135_v7 }
  0x73   :  { %v157_v23 = vsel %vm156_vm3, %v147_v21, %v146_v20 }
  0x74   :  { %v159_v24 = vsel %vm153_vm4, %v157_v23, 0.0 }
  0x75   :  { %v161_v25 = vadd.f32 %v160_v22, %v159_v24 }
  0x77   :  { %162 = vst [vmem:[#allocation2] sm:$0x3] %v161_v25 }
  0x7e   :  { %v166_v26 = vld [vmem:[#allocation2] sm:$0x3] }
  0x7f   :  { %v168_v27 = vsel %vm167_vm5, %v166_v26, 0.0 }
  0x80   :  { %169 = vadd.xlane.f32.xlu0 %v168_v27 }
 0x109   :  { %v170_v28 = vpop.xlane.xlu0 %169 }
 0x10a   :  { %172 = vst.msk [vmem:[%s282_s2] sm:$0x3] %vm171_vm6, %v170_v28 }
 0x10b   :  { %177 = vsyncpa [#allocation4], 1 }
 0x10c   :  { %178 = vsyncpa [#allocation6], 1 }

</bundles_post_ra>
